<compile_context>
chip_gen: v7x
topology: tpu7x:2x2x1
jax: 0.10.0
libtpu: 0.0.40
codegen_flags: <defaults>
</compile_context>

<pallas_src>
import numpy as np
import jax
import jax.numpy as jnp
from jax.experimental import pallas as pl
from jax.experimental.pallas import tpu as pltpu

# ----------------------------------------------------------------------------
# Model hyper-parameters (small, synthetic, lane-friendly)
# ----------------------------------------------------------------------------
VOCAB = 128          # V (multiple of 128 -> lane-dense one-hot)
EMBED_DIM = 128      # D (multiple of 128 -> lane-dense activations/outputs)
FFN_DIM = 256        # H
PAD_IDX = 0
NEG_INF_F32 = -1e20  # ParlAI neginf(torch.float32)


# ----------------------------------------------------------------------------
# Fused kernel:
#   tokens -> one-hot embedding matmul -> 2-layer FFN -> enc (M, D)
#   enc    -> universal sentence embedding (segment-sum matmul, rsqrt)
#          -> knowledge/context attention + masked_fill -> attn (N*K, 1)
# ----------------------------------------------------------------------------
def _ck_encoder_kernel(tok_ref, emb_ref, w1_ref, b1_ref, w2_ref, b2_ref,
                       s_use_ref, s_ctx_ref, ckm_ref, enc_ref, attn_ref):
    m = tok_ref.shape[0]
    v, d = emb_ref.shape
    n = s_ctx_ref.shape[1]

    tok = tok_ref[...]                                               # (M, 1) int32

    # --- embedding lookup fused as one-hot(token) @ table on the MXU (bf16/f32 acc)
    vocab_iota = jax.lax.broadcasted_iota(jnp.int32, (m, v), 1)
    onehot = jnp.where(vocab_iota == tok, 1.0, 0.0).astype(jnp.bfloat16)   # (M, V)
    emb = jnp.dot(onehot, emb_ref[...].astype(jnp.bfloat16),
                  preferred_element_type=jnp.float32)                # (M, D) f32

    # --- 2-layer FFN "transformer" stand-in: bf16 matmul operands, f32 accumulate;
    #     elementwise math stays f32 (v5e has no bf16 VPU/EUP path).
    h = jnp.dot(emb.astype(jnp.bfloat16), w1_ref[...].astype(jnp.bfloat16),
                preferred_element_type=jnp.float32) + b1_ref[...]    # (M, H)
    h = jnp.maximum(h, 0.0)
    enc = jnp.dot(h.astype(jnp.bfloat16), w2_ref[...].astype(jnp.bfloat16),
                  preferred_element_type=jnp.float32) + b2_ref[...]  # (M, D)
    enc_ref[...] = enc

    # --- universal sentence embedding: masked time-sum as a matmul with a static
    #     segment-selection matrix (MXU); sqrt-divide replaced by rsqrt (EUP).
    mask_col = (tok != PAD_IDX).astype(jnp.float32)                  # (M, 1)
    masked_enc = enc * mask_col                                      # (M, D)
    s_use = s_use_ref[...]                                           # (NSENT, M)
    sums = jnp.dot(s_use, masked_enc, preferred_element_type=jnp.float32)  # (NSENT, D)
    lens = jnp.dot(s_use, mask_col, preferred_element_type=jnp.float32)    # (NSENT, 1)
    # clamp guards an all-pad sentence (the PyTorch original would produce NaN there)
    use_all = sums * jax.lax.rsqrt(jnp.maximum(lens, 1.0))           # (NSENT, D)

    ctx_use = use_all[:n]                                            # (N, D)
    know_use = use_all[n:]                                           # (N*K, D)

    # --- knowledge/context attention: raw <know, ctx> dots on the MXU, select the
    #     matching context per knowledge row, then a SINGLE 1/D scale of the tiny
    #     result ((a/sqrt(D))·(b/sqrt(D)) == (a·b)/D), then masked_fill.
    dots = jax.lax.dot_general(know_use, ctx_use, (((1,), (1,)), ((), ())),
                               preferred_element_type=jnp.float32)   # (N*K, N)
    attn = jnp.sum(dots * s_ctx_ref[...], axis=1, keepdims=True) * (1.0 / d)  # (N*K, 1)
    attn_ref[...] = jnp.where(ckm_ref[...] > 0.5, attn, jnp.float32(NEG_INF_F32))


def fused_ck_encode(params, tokens_col, s_use, s_ctx, ck_mask_col):
    """tokens_col: (M,1) int32; returns (enc (M,D) f32, attn (N*K,1) f32)."""
    m = tokens_col.shape[0]
    d = params["embed"].shape[1]
    nk = ck_mask_col.shape[0]
    vmem = pltpu.MemorySpace.VMEM
    # Everything (<1 MiB total at these sizes) fits in VMEM in one grid step.
    # For large M / N*K: tile the FFN over rows (tm>=256, dimension_semantics
    # ("parallel",)) and the USE/attention stage over N so the working set stays
    # well under v7x's 64 MiB VMEM with double-buffering.
    return pl.pallas_call(
        _ck_encoder_kernel,
        out_shape=(jax.ShapeDtypeStruct((m, d), jnp.float32),
                   jax.ShapeDtypeStruct((nk, 1), jnp.float32)),
        in_specs=[pl.BlockSpec(memory_space=vmem)] * 9,
        out_specs=[pl.BlockSpec(memory_space=vmem),
                   pl.BlockSpec(memory_space=vmem)],
    )(tokens_col, params["embed"], params["w1"], params["b1"],
      params["w2"], params["b2"], s_use, s_ctx, ck_mask_col)


# ----------------------------------------------------------------------------
# Static selection matrices (compile-time constants, built once per shape)
# ----------------------------------------------------------------------------
def build_selection_matrices(n, k, ts, tk):
    nsent = n + n * k
    seg = np.concatenate([np.repeat(np.arange(n), ts),
                          n + np.repeat(np.arange(n * k), tk)])                 # (M,)
    s_use = (np.arange(nsent)[:, None] == seg[None, :]).astype(np.float32)      # (NSENT, M)
    s_ctx = (np.repeat(np.arange(n), k)[:, None]
             == np.arange(n)[None, :]).astype(np.float32)                       # (N*K, N)
    return jnp.asarray(s_use), jnp.asarray(s_ctx)


# ----------------------------------------------------------------------------
# Parameters for the deterministic transformer stand-in
# ----------------------------------------------------------------------------
def make_params(key):
    k_emb, k_w1, k_b1, k_w2, k_b2 = jax.random.split(key, 5)
    params = {
        "embed": jax.random.normal(k_emb, (VOCAB, EMBED_DIM), jnp.float32) * 0.1,
        "w1": jax.random.normal(k_w1, (EMBED_DIM, FFN_DIM), jnp.float32) * 0.1,
        "b1": jax.random.normal(k_b1, (1, FFN_DIM), jnp.float32) * 0.01,
        "w2": jax.random.normal(k_w2, (FFN_DIM, EMBED_DIM), jnp.float32) * 0.1,
        "b2": jax.random.normal(k_b2, (1, EMBED_DIM), jnp.float32) * 0.01,
    }
    # padding embedding is zero (like nn.Embedding(padding_idx=0))
    params["embed"] = params["embed"].at[PAD_IDX].set(0.0)
    return params


# ----------------------------------------------------------------------------
# ContextKnowledgeEncoder.forward  (soft_attention=False, as in __init__)
# ----------------------------------------------------------------------------
def context_knowledge_encoder_forward(params, src_tokens, know_tokens,
                                      ck_mask, cs_ids, use_cs_ids):
    n, ts = src_tokens.shape
    _, k, tk = know_tokens.shape
    d = params["embed"].shape[1]

    # One concatenated token slab -> one fused pallas_call for context + knowledge.
    tokens_col = jnp.concatenate(
        [src_tokens.reshape(-1), know_tokens.reshape(-1)]).astype(jnp.int32).reshape(-1, 1)
    s_use, s_ctx = build_selection_matrices(n, k, ts, tk)
    ck_mask_col = ck_mask.astype(jnp.float32).reshape(n * k, 1)

    enc_all, attn_col = fused_ck_encode(params, tokens_col, s_use, s_ctx, ck_mask_col)

    ck_attn = attn_col.reshape(n, k)                                  # (N, K)
    context_encoded = enc_all[:n * ts].reshape(n, ts, d)              # (N, Ts, D)
    know_encoded = enc_all[n * ts:].reshape(n * k, tk, d)             # (N*K, Tk, D)
    context_mask = src_tokens != PAD_IDX
    know_mask = know_tokens.reshape(n * k, tk) != PAD_IDX

    # TODO(synk): soft_attention branch (statically False in __init__) not implemented.
    if not use_cs_ids:
        cs_ids = jnp.argmax(ck_attn, axis=1).astype(jnp.int32)
    cs_offsets = jnp.arange(n, dtype=jnp.int32) * k + cs_ids          # (N,)
    cs_encoded = jnp.take(know_encoded, cs_offsets, axis=0)           # (N, Tk, D)
    cs_mask = jnp.take(know_mask, cs_offsets, axis=0)                 # (N, Tk)

    full_enc = jnp.concatenate([cs_encoded, context_encoded], axis=1)
    full_mask = jnp.concatenate([cs_mask, context_mask], axis=1)
    return full_enc, full_mask, ck_attn


# ----------------------------------------------------------------------------
# Pure-JAX f32 reference (mirrors the PyTorch module with the same stand-in)
# ----------------------------------------------------------------------------
def reference_forward(params, src_tokens, know_tokens, ck_mask, cs_ids, use_cs_ids):
    def enc_fn(tok2d):
        mask = tok2d != PAD_IDX
        emb = jnp.take(params["embed"], tok2d, axis=0)
        h = jnp.maximum(emb @ params["w1"] + params["b1"], 0.0)
        return h @ params["w2"] + params["b2"], mask

    def use_fn(enc, mask):
        s = jnp.einsum("ntd,nt->nd", enc, mask.astype(jnp.float32))
        div = jnp.sqrt(jnp.sum(mask, axis=1, keepdims=True).astype(jnp.float32))
        return s / div

    n, k, tk = know_tokens.shape
    ctx_enc, ctx_mask = enc_fn(src_tokens)
    know_enc, know_mask = enc_fn(know_tokens.reshape(-1, tk))
    ctx_use = use_fn(ctx_enc, ctx_mask) / np.sqrt(EMBED_DIM)
    know_use = use_fn(know_enc, know_mask).reshape(n, k, EMBED_DIM) / np.sqrt(EMBED_DIM)
    ck_attn = jnp.einsum("nkd,nd->nk", know_use, ctx_use)
    ck_attn = jnp.where(ck_mask, ck_attn, jnp.float32(NEG_INF_F32))
    if not use_cs_ids:
        cs_ids = jnp.argmax(ck_attn, axis=1).astype(jnp.int32)
    off = jnp.arange(n, dtype=jnp.int32) * k + cs_ids
    full_enc = jnp.concatenate([know_enc[off], ctx_enc], axis=1)
    full_mask = jnp.concatenate([know_mask[off], ctx_mask], axis=1)
    return full_enc, full_mask, ck_attn


# ----------------------------------------------------------------------------
# Demo
# ----------------------------------------------------------------------------
if __name__ == "__main__":
    key = jax.random.PRNGKey(0)
    k_par, k_src, k_know = jax.random.split(key, 3)
    params = make_params(k_par)

    N, K, Ts, Tk = 2, 3, 8, 8
    src_tokens = jax.random.randint(k_src, (N, Ts), 1, VOCAB, dtype=jnp.int32)
    src_tokens = src_tokens.at[:, 6:].set(PAD_IDX)            # pad tail
    know_tokens = jax.random.randint(k_know, (N, K, Tk), 1, VOCAB, dtype=jnp.int32)
    know_tokens = know_tokens.at[:, :, 5:].set(PAD_IDX)       # pad tail

    ck_mask = jnp.ones((N, K), dtype=bool).at[0, 2].set(False)
    cs_ids = jnp.zeros((N,), dtype=jnp.int32)

    # Path 1: use provided cs_ids (deterministic selection -> compare vs reference)
    out1 = context_knowledge_encoder_forward(
        params, src_tokens, know_tokens, ck_mask, cs_ids, use_cs_ids=True)
    # Path 2: pick knowledge via argmax over ck_attn
    out2 = context_knowledge_encoder_forward(
        params, src_tokens, know_tokens, ck_mask, cs_ids, use_cs_ids=False)
    jax.block_until_ready(out1)
    jax.block_until_ready(out2)

    ref1 = reference_forward(params, src_tokens, know_tokens, ck_mask, cs_ids, True)
    full_enc1, full_mask1, ck_attn1 = out1
    ref_enc1, ref_mask1, ref_attn1 = ref1
    np.testing.assert_allclose(np.asarray(full_enc1), np.asarray(ref_enc1),
                               rtol=0, atol=2e-2)     # bf16-operand matmul tolerance
    np.testing.assert_allclose(np.asarray(ck_attn1), np.asarray(ref_attn1),
                               rtol=0, atol=2e-3)
    assert np.array_equal(np.asarray(full_mask1), np.asarray(ref_mask1))

    full_enc2, full_mask2, ck_attn2 = out2
    assert full_enc2.shape == (N, Tk + Ts, EMBED_DIM)
    assert full_mask2.shape == (N, Tk + Ts)
    assert ck_attn2.shape == (N, K)
    assert bool(ck_attn2[0, 2] <= NEG_INF_F32 / 2)    # masked position filled with neginf

    print("KERNEL_OK")
</pallas_src>

<mosaic_0001>
module attributes {stable_mosaic.version = 11 : i64} {
  func.func @_ck_encoder_kernel(%arg0: memref<64x1xi32, #tpu.memory_space<vmem>>, %arg1: memref<128x128xf32, #tpu.memory_space<vmem>>, %arg2: memref<128x256xf32, #tpu.memory_space<vmem>>, %arg3: memref<1x256xf32, #tpu.memory_space<vmem>>, %arg4: memref<256x128xf32, #tpu.memory_space<vmem>>, %arg5: memref<1x128xf32, #tpu.memory_space<vmem>>, %arg6: memref<8x64xf32, #tpu.memory_space<vmem>>, %arg7: memref<6x2xf32, #tpu.memory_space<vmem>>, %arg8: memref<6x1xf32, #tpu.memory_space<vmem>>, %arg9: memref<64x128xf32, #tpu.memory_space<vmem>>, %arg10: memref<6x1xf32, #tpu.memory_space<vmem>>) attributes {dimension_semantics = [], scalar_prefetch = 0 : i64, scratch_operands = 0 : i64, tpu.core_type = #tpu.core_type<tc>} {
    %c0 = arith.constant 0 : index
    %c0_0 = arith.constant 0 : index
    %0 = vector.load %arg0[%c0, %c0_0] : memref<64x1xi32, #tpu.memory_space<vmem>>, vector<64x1xi32>
    %1 = tpu.iota {dimensions = array<i32: 1>} : vector<64x128xi32>
    %2 = vector.broadcast %0 : vector<64x1xi32> to vector<64x128xi32>
    %3 = arith.cmpi eq, %1, %2 : vector<64x128xi32>
    %cst = arith.constant 1.000000e+00 : f32
    %cst_1 = arith.constant 0.000000e+00 : f32
    %4 = vector.broadcast %cst : f32 to vector<64x128xf32>
    %5 = vector.broadcast %cst_1 : f32 to vector<64x128xf32>
    %6 = arith.select %3, %4, %5 : vector<64x128xi1>, vector<64x128xf32>
    %7 = arith.truncf %6 : vector<64x128xf32> to vector<64x128xbf16>
    %c0_2 = arith.constant 0 : index
    %c0_3 = arith.constant 0 : index
    %8 = vector.load %arg1[%c0_2, %c0_3] : memref<128x128xf32, #tpu.memory_space<vmem>>, vector<128x128xf32>
    %9 = arith.truncf %8 : vector<128x128xf32> to vector<128x128xbf16>
    %cst_4 = arith.constant dense<0.000000e+00> : vector<64x128xf32>
    %10 = tpu.matmul %7, %9, %cst_4 {dimension_numbers = #tpu.dot_dimension_numbers<[1], [0], [0], [1], [0, 0, 1, 1], [], []>} : vector<64x128xbf16>, vector<128x128xbf16>, vector<64x128xf32> -> vector<64x128xf32>
    %11 = arith.truncf %10 : vector<64x128xf32> to vector<64x128xbf16>
    %c0_5 = arith.constant 0 : index
    %c0_6 = arith.constant 0 : index
    %12 = vector.load %arg2[%c0_5, %c0_6] : memref<128x256xf32, #tpu.memory_space<vmem>>, vector<128x256xf32>
    %13 = arith.truncf %12 : vector<128x256xf32> to vector<128x256xbf16>
    %cst_7 = arith.constant dense<0.000000e+00> : vector<64x256xf32>
    %14 = tpu.matmul %11, %13, %cst_7 {dimension_numbers = #tpu.dot_dimension_numbers<[1], [0], [0], [1], [0, 0, 1, 1], [], []>} : vector<64x128xbf16>, vector<128x256xbf16>, vector<64x256xf32> -> vector<64x256xf32>
    %c0_8 = arith.constant 0 : index
    %c0_9 = arith.constant 0 : index
    %15 = vector.load %arg3[%c0_8, %c0_9] : memref<1x256xf32, #tpu.memory_space<vmem>>, vector<1x256xf32>
    %16 = vector.broadcast %15 : vector<1x256xf32> to vector<64x256xf32>
    %17 = arith.addf %14, %16 : vector<64x256xf32>
    %cst_10 = arith.constant 0.000000e+00 : f32
    %18 = vector.broadcast %cst_10 : f32 to vector<64x256xf32>
    %19 = arith.maximumf %17, %18 : vector<64x256xf32>
    %20 = arith.truncf %19 : vector<64x256xf32> to vector<64x256xbf16>
    %c0_11 = arith.constant 0 : index
    %c0_12 = arith.constant 0 : index
    %21 = vector.load %arg4[%c0_11, %c0_12] : memref<256x128xf32, #tpu.memory_space<vmem>>, vector<256x128xf32>
    %22 = arith.truncf %21 : vector<256x128xf32> to vector<256x128xbf16>
    %cst_13 = arith.constant dense<0.000000e+00> : vector<64x128xf32>
    %23 = tpu.matmul %20, %22, %cst_13 {dimension_numbers = #tpu.dot_dimension_numbers<[1], [0], [0], [1], [0, 0, 1, 1], [], []>} : vector<64x256xbf16>, vector<256x128xbf16>, vector<64x128xf32> -> vector<64x128xf32>
    %c0_14 = arith.constant 0 : index
    %c0_15 = arith.constant 0 : index
    %24 = vector.load %arg5[%c0_14, %c0_15] : memref<1x128xf32, #tpu.memory_space<vmem>>, vector<1x128xf32>
    %25 = vector.broadcast %24 : vector<1x128xf32> to vector<64x128xf32>
    %26 = arith.addf %23, %25 : vector<64x128xf32>
    %c0_16 = arith.constant 0 : index
    %c0_17 = arith.constant 0 : index
    %27 = vector.load %arg9[%c0_16, %c0_17] : memref<64x128xf32, #tpu.memory_space<vmem>>, vector<64x128xf32>
    tpu.vector_store %arg9[%c0_16, %c0_17], %26 {strides = array<i32>} : memref<64x128xf32, #tpu.memory_space<vmem>>, vector<64x128xf32>,
    %c0_i32 = arith.constant 0 : i32
    %28 = vector.broadcast %c0_i32 : i32 to vector<64x1xi32>
    %29 = arith.cmpi ne, %0, %28 : vector<64x1xi32>
    %30 = arith.extui %29 : vector<64x1xi1> to vector<64x1xi32>
    %31 = arith.sitofp %30 : vector<64x1xi32> to vector<64x1xf32>
    %32 = vector.broadcast %31 : vector<64x1xf32> to vector<64x128xf32>
    %33 = arith.mulf %26, %32 : vector<64x128xf32>
    %c0_18 = arith.constant 0 : index
    %c0_19 = arith.constant 0 : index
    %34 = vector.load %arg6[%c0_18, %c0_19] : memref<8x64xf32, #tpu.memory_space<vmem>>, vector<8x64xf32>
    %cst_20 = arith.constant dense<0.000000e+00> : vector<8x128xf32>
    %35 = tpu.matmul %34, %33, %cst_20 {dimension_numbers = #tpu.dot_dimension_numbers<[1], [0], [0], [1], [0, 0, 1, 1], [], []>} : vector<8x64xf32>, vector<64x128xf32>, vector<8x128xf32> -> vector<8x128xf32>
    %cst_21 = arith.constant dense<0.000000e+00> : vector<8x1xf32>
    %36 = tpu.matmul %34, %31, %cst_21 {dimension_numbers = #tpu.dot_dimension_numbers<[1], [0], [0], [1], [0, 0, 1, 1], [], []>} : vector<8x64xf32>, vector<64x1xf32>, vector<8x1xf32> -> vector<8x1xf32>
    %cst_22 = arith.constant 1.000000e+00 : f32
    %37 = vector.broadcast %cst_22 : f32 to vector<8x1xf32>
    %38 = arith.maximumf %36, %37 : vector<8x1xf32>
    %39 = math.rsqrt %38 : vector<8x1xf32>
    %40 = vector.broadcast %39 : vector<8x1xf32> to vector<8x128xf32>
    %41 = arith.mulf %35, %40 : vector<8x128xf32>
    %42 = vector.extract_strided_slice %41 {offsets = [0, 0], sizes = [2, 128], strides = [1, 1]} : vector<8x128xf32> to vector<2x128xf32>
    %43 = vector.extract_strided_slice %41 {offsets = [2, 0], sizes = [6, 128], strides = [1, 1]} : vector<8x128xf32> to vector<6x128xf32>
    %cst_23 = arith.constant dense<0.000000e+00> : vector<6x2xf32>
    %44 = tpu.matmul %43, %42, %cst_23 {dimension_numbers = #tpu.dot_dimension_numbers<[1], [1], [0], [0], [0, 0, 1, 0], [], []>} : vector<6x128xf32>, vector<2x128xf32>, vector<6x2xf32> -> vector<6x2xf32>
    %c0_24 = arith.constant 0 : index
    %c0_25 = arith.constant 0 : index
    %45 = vector.load %arg7[%c0_24, %c0_25] : memref<6x2xf32, #tpu.memory_space<vmem>>, vector<6x2xf32>
    %46 = arith.mulf %44, %45 : vector<6x2xf32>
    %cst_26 = arith.constant dense<0.000000e+00> : vector<6xf32>
    %47 = vector.multi_reduction <add>, %46, %cst_26 [1] : vector<6x2xf32> to vector<6xf32>
    %48 = vector.shape_cast %47 : vector<6xf32> to vector<6x1xf32>
    %cst_27 = arith.constant 7.812500e-03 : f32
    %49 = vector.broadcast %cst_27 : f32 to vector<6x1xf32>
    %50 = arith.mulf %48, %49 : vector<6x1xf32>
    %c0_28 = arith.constant 0 : index
    %c0_29 = arith.constant 0 : index
    %51 = vector.load %arg8[%c0_28, %c0_29] : memref<6x1xf32, #tpu.memory_space<vmem>>, vector<6x1xf32>
    %cst_30 = arith.constant 5.000000e-01 : f32
    %52 = vector.broadcast %cst_30 : f32 to vector<6x1xf32>
    %53 = arith.cmpf ogt, %51, %52 : vector<6x1xf32>
    %cst_31 = arith.constant -1.000000e+20 : f32
    %54 = vector.broadcast %cst_31 : f32 to vector<6x1xf32>
    %55 = arith.select %53, %50, %54 : vector<6x1xi1>, vector<6x1xf32>
    %c0_32 = arith.constant 0 : index
    %c0_33 = arith.constant 0 : index
    %56 = vector.load %arg10[%c0_32, %c0_33] : memref<6x1xf32, #tpu.memory_space<vmem>>, vector<6x1xf32>
    tpu.vector_store %arg10[%c0_32, %c0_33], %55 {strides = array<i32>} : memref<6x1xf32, #tpu.memory_space<vmem>>, vector<6x1xf32>,
    return
  }
}

</mosaic_0001>

<bundles_post_ra>
// kernel: tpu_custom_call.1
= control target key start
LH: loop header
LB: loop body
LE: loop exit
PB: predicated region body
PF: predicated region fallthrough
CT: control target
= control target key end

     0   :  { %16 = vsyncpa [#allocation3], 0  ;;  %s1418_s0 = inlined_call_operand.vmem [shape: s32[64,1], index: 0, kind: input, shape index: {}]   ;;  %s1419_s1 = inlined_call_operand.hbm [shape: f32[128,128], index: 1, kind: input, shape index: {}]   ;;  %s1420_s2 = inlined_call_operand.hbm [shape: f32[128,256], index: 2, kind: input, shape index: {}]   ;;  %s1421_s3 = inlined_call_operand.vmem [shape: f32[1,256], index: 3, kind: input, shape index: {}]   ;;  %s1422_s4 = inlined_call_operand.hbm [shape: f32[256,128], index: 4, kind: input, shape index: {}]   ;;  %s1423_s5 = inlined_call_operand.vmem [shape: f32[1,128], index: 5, kind: input, shape index: {}]   ;;  %s1424_s6 = inlined_call_operand.vmem [shape: f32[8,64], index: 6, kind: input, shape index: {}]   ;;  %s1425_s7 = inlined_call_operand.vmem [shape: f32[6,2], index: 7, kind: input, shape index: {}]   ;;  %s1426_s8 = inlined_call_operand.vmem [shape: f32[6,1], index: 8, kind: input, shape index: {}]   ;;  %s1427_s9 = inlined_call_operand.hbm [shape: f32[64,128], index: 9, kind: output, shape index: {0}]   ;;  %s1428_s10 = inlined_call_operand.vmem [shape: f32[6,1], index: 10, kind: output, shape index: {1}]  }
   0x1   :  { %17 = vsyncpa [#allocation6], 0 }
   0x2   :  { %18 = vsyncpa [#allocation4], 0  ;;  %s1162_s13 = smov [#allocation5]   ;;  %s1068_s17 = scalar_lea.hbm %s1420_s2, 4096 }
   0x3   :  { %s38_s14 = sshll.u32 %s1162_s13, 4  ;;  %p1069_p0 = scmp.ne.s32.totalorder %s1420_s2, %s1068_s17  ;;  %s39_s14 = int_to_ptr.vmem [resolvable:$true] %s38_s14 }
   0x4   :  { %p1072_p1 = scmp.lt.u32.totalorder %s1068_s17, %s1420_s2 }
   0x6   :  { %p1074_p2 = pnand %p1072_p1, %p1069_p0 }
   0x8   :  { %1077 = shalt.err (!%p1074_p2)
}
   0x9   :  { %s1078_s22 = scalar_lea.vmem %s39_s14, 4096  ;;  %p1083_p4 = scmp.lt.s32.totalorder %s39_s14, %s39_s14 }
   0xa   :  { %p1079_p3 = scmp.ne.s32.totalorder %s39_s14, %s1078_s22  ;;  %p1084_p5 = scmp.lt.s32.totalorder %s1078_s22, %s1078_s22 }
   0xc   :  { %p1085_p6 = por %p1084_p5, %p1083_p4 }
   0xe   :  { %p1086_p7 = pnand %p1085_p6, %p1079_p3 }
  0x10   :  { %1089 = shalt.err (!%p1086_p7)
}
  0x11   :  { %s1163_s23 = smov 256   ;;  %s1164_s24 = smov 16  }
  0x12   :  { %44 = dma.hbm_to_vmem [thread:$0]  %s1420_s2, 4096, %s39_s14, [#allocation6], %s1163_s23, %s1163_s23, %s1164_s24  }
  0x13   :  { %s1165_s27 = smov [#allocation2]   ;;  %s1090_s11 = scalar_lea.hbm %s1419_s1, 2048 }
  0x14   :  { %s26_s28 = sshll.u32 %s1165_s27, 4  ;;  %p1091_p8 = scmp.ne.s32.totalorder %s1419_s1, %s1090_s11  ;;  %s27_s28 = int_to_ptr.vmem [resolvable:$true] %s26_s28 }
  0x15   :  { %p1094_p9 = scmp.lt.u32.totalorder %s1090_s11, %s1419_s1 }
  0x17   :  { %p1096_p10 = pnand %p1094_p9, %p1091_p8 }
  0x19   :  { %1099 = shalt.err (!%p1096_p10)
}
  0x1a   :  { %s1100_s17 = scalar_lea.vmem %s27_s28, 2048  ;;  %p1105_p12 = scmp.lt.s32.totalorder %s27_s28, %s27_s28 }
  0x1b   :  { %p1101_p11 = scmp.ne.s32.totalorder %s27_s28, %s1100_s17  ;;  %p1106_p13 = scmp.lt.s32.totalorder %s1100_s17, %s1100_s17 }
  0x1d   :  { %p1107_p0 = por %p1106_p13, %p1105_p12 }
  0x1f   :  { %p1108_p1 = pnand %p1107_p0, %p1101_p11 }
  0x21   :  { %1111 = shalt.err (!%p1108_p1)
}
  0x22   :  { %s1166_s2 = smov 128   ;;  %s1167_s14 = smov 8  }
  0x23   :  { %32 = dma.hbm_to_vmem [thread:$0]  %s1419_s1, 2048, %s27_s28, [#allocation3], %s1166_s2, %s1166_s2, %s1167_s14  }
  0x24   :  { %s1168_s20 = smov [#allocation7]   ;;  %s1112_s24 = scalar_lea.hbm %s1422_s4, 4096 }
  0x25   :  { %s52_s21 = sshll.u32 %s1168_s20, 4  ;;  %p1113_p2 = scmp.ne.s32.totalorder %s1422_s4, %s1112_s24  ;;  %s53_s21 = int_to_ptr.vmem [resolvable:$true] %s52_s21 }
  0x26   :  { %p1116_p3 = scmp.lt.u32.totalorder %s1112_s24, %s1422_s4 }
  0x28   :  { %p1118_p4 = pnand %p1116_p3, %p1113_p2 }
  0x2a   :  { %1121 = shalt.err (!%p1118_p4)
}
  0x2b   :  { %s1122_s30 = scalar_lea.vmem %s53_s21, 4096  ;;  %p1127_p6 = scmp.lt.s32.totalorder %s53_s21, %s53_s21 }
  0x2c   :  { %p1123_p5 = scmp.ne.s32.totalorder %s53_s21, %s1122_s30  ;;  %p1128_p7 = scmp.lt.s32.totalorder %s1122_s30, %s1122_s30 }
  0x2e   :  { %p1129_p8 = por %p1128_p7, %p1127_p6 }
  0x30   :  { %p1130_p9 = pnand %p1129_p8, %p1123_p5 }
  0x32   :  { %1133 = shalt.err (!%p1130_p9)
}
  0x33   :  { %58 = dma.hbm_to_vmem [thread:$0]  %s1422_s4, 4096, %s53_s21, [#allocation6], %s1166_s2, %s1166_s2, %s1167_s14  }
  0x34   :  { %1156 = dma.done.wait [#allocation3], 2048  }
  0x35   :  { %1157 = vsyncadd [#allocation3], 4294965248 }
  0x36   :  { %1158 = dma.done.wait [#allocation6], 8192  }
  0x37   :  { %1159 = vsyncadd [#allocation6], 4294959104  ;;  %v1169_v0 = vmov 0   ;;  %v79_v1 = vld [vmem:[%s1418_s0 + $0x10] sm:$0xff]  ;;  %v77_v2 = vld [vmem:[%s1418_s0] sm:$0xff]  ;;  %v1170_v21 = vmov 0.0  }
  0x38   :  { %1045 = vset.pattern.permute.xlu1 %v1169_v0  ;;  %1044 = vset.pattern.permute.xlu0 %v1169_v0  ;;  %v80_v3 = vld [vmem:[%s1418_s0 + $0x18] sm:$0xff]  ;;  %vm511_vm0 = vcmp.ne.s32.totalorder %v79_v1, 0  ;;  %v78_v4 = vld [vmem:[%s1418_s0 + $0x8] sm:$0xff]  ;;  %v81_v6 = vld [vmem:[%s1418_s0 + $0x20] sm:$0xff]  ;;  %vm509_vm2 = vcmp.ne.s32.totalorder %v77_v2, 0  ;;  %s1174_s28 = smov [#allocation8]  }
  0x39   :  { %316 = vmatprep.mubr.bf16.mxu1 %v1169_v0  ;;  %94 = vperm.xlu1 %1045, %v79_v1   ;;  %vm512_vm1 = vcmp.ne.s32.totalorder %v80_v3, 0  ;;  %v82_v5 = vld [vmem:[%s1418_s0 + $0x28] sm:$0xff]  ;;  %vm510_vm4 = vcmp.ne.s32.totalorder %v78_v4, 0  ;;  %v84_v8 = vld [vmem:[%s1418_s0 + $0x38] sm:$0xff]  ;;  %v83_v9 = vld [vmem:[%s1418_s0 + $0x30] sm:$0xff]  ;;  %vm513_vm7 = vcmp.ne.s32.totalorder %v81_v6, 0 }
  0x3a   :  { %88 = vperm.xlu0 %1044, %v77_v2   ;;  %vm1295_vm3 = vmpackc.low %vm512_vm1, %vm511_vm0  ;;  %vm514_vm6 = vcmp.ne.s32.totalorder %v82_v5, 0  ;;  %v131_v11 = vld [vmem:[#allocation2] sm:$0xff]  ;;  %v132_v12 = vld [vmem:[#allocation2 + $0x8] sm:$0xff]  ;;  %vm516_vm9 = vcmp.ne.s32.totalorder %v84_v8, 0  ;;  %vm515_vm10 = vcmp.ne.s32.totalorder %v83_v9, 0  ;;  %v852_v22 = vsel %vm511_vm0, 1.0, %v1170_v21 }
  0x3b   :  { %vm1307_vm5 = vmpackc.low %vm510_vm4, %vm509_vm2  ;;  %v133_v14 = vld [vmem:[#allocation2 + $0x10] sm:$0xff]  ;;  %v134_v15 = vld [vmem:[#allocation2 + $0x18] sm:$0xff]  ;;  %v147_v17 = vpack.c.bf16 %v132_v12, %v131_v11  ;;  %v850_v23 = vsel %vm509_vm2, 1.0, %v1170_v21  ;;  %v853_v24 = vsel %vm512_vm1, 1.0, %v1170_v21  ;;  %v851_v25 = vsel %vm510_vm4, 1.0, %v1170_v21  ;;  %s824_s11 = sshll.u32 %s1174_s28, 4  ;;  %s825_s11 = int_to_ptr.vmem [resolvable:$true] %s824_s11 }
  0x3c   :  { %vm1313_vm8 = vmpackc.low %vm514_vm6, %vm513_vm7  ;;  %v148_v18 = vpack.c.bf16 %v134_v15, %v133_v14  ;;  %v135_v19 = vld [vmem:[#allocation2 + $0x20] sm:$0xff]  ;;  %v136_v20 = vld [vmem:[#allocation2 + $0x28] sm:$0xff]  ;;  %v1051_v29 = vpack.i.bf16 %v853_v24, %v852_v22  ;;  %v1046_v30 = vpack.i.bf16 %v851_v25, %v850_v23  ;;  %v855_v31 = vsel %vm514_vm6, 1.0, %v1170_v21  ;;  %s1134_s12 = scalar_lea.vmem %s825_s11, 1024  ;;  %p1139_p11 = scmp.lt.s32.totalorder %s825_s11, %s825_s11 }
  0x3d   :  { %97 = vperm.xlu1 %1045, %v80_v3   ;;  %vm1319_vm11 = vmpackc.low %vm516_vm9, %vm515_vm10  ;;  %940 = vmatprep.subr.bf16.mxu0 %v147_v17  ;;  %v149_v26 = vpack.c.bf16 %v136_v20, %v135_v19  ;;  %v137_v27 = vld [vmem:[#allocation2 + $0x30] sm:$0xff]  ;;  %v138_v28 = vld [vmem:[#allocation2 + $0x38] sm:$0xff]  ;;  %v854_v32 = vsel %vm513_vm7, 1.0, %v1170_v21  ;;  %v857_v33 = vsel %vm516_vm9, 1.0, %v1170_v21  ;;  %v856_v34 = vsel %vm515_vm10, 1.0, %v1170_v21  ;;  %p1135_p10 = scmp.ne.s32.totalorder %s825_s11, %s1134_s12  ;;  %p1140_p12 = scmp.lt.s32.totalorder %s1134_s12, %s1134_s12 }
  0x3e   :  { %91 = vperm.xlu0 %1044, %v78_v4   ;;  %941 = vmatpush3.bf16.msra.mxu0 %v147_v17  ;;  %v150_v35 = vpack.c.bf16 %v138_v28, %v137_v27  ;;  %v139_v36 = vld [vmem:[#allocation2 + $0x40] sm:$0xff]  ;;  %v140_v37 = vld [vmem:[#allocation2 + $0x48] sm:$0xff]  ;;  %v1061_v38 = vpack.i.bf16 %v857_v33, %v856_v34  ;;  %v1056_v39 = vpack.i.bf16 %v855_v31, %v854_v32  ;;  %v141_v41 = vld [vmem:[#allocation2 + $0x50] sm:$0xff]  ;;  %v85_v34 = vlaneseq }
  0x3f   :  { %942 = vmatprep.subr.bf16.mxu0 %v148_v18  ;;  %v151_v40 = vpack.c.bf16 %v140_v37, %v139_v36  ;;  %v142_v42 = vld [vmem:[#allocation2 + $0x58] sm:$0xff]  ;;  %v225_v43 = vld [vmem:[#allocation5 + $0x8] sm:$0xff]  ;;  %v224_v45 = vld [vmem:[#allocation5] sm:$0xff]  ;;  %p1141_p13 = por %p1140_p12, %p1139_p11 }
  0x40   :  { %v227_v44 = vld [vmem:[#allocation5 + $0x18] sm:$0xff]  ;;  %v226_v47 = vld [vmem:[#allocation5 + $0x10] sm:$0xff]  ;;  %v229_v48 = vld [vmem:[#allocation5 + $0x28] sm:$0xff]  ;;  %v152_v50 = vpack.c.bf16 %v142_v42, %v141_v41  ;;  %v86_v37 = vand.u32 127, %v85_v34 }
  0x41   :  { %103 = vperm.xlu1 %1045, %v82_v5   ;;  %v257_v46 = vpack.c.bf16 %v227_v44, %v225_v43  ;;  %v231_v49 = vld [vmem:[#allocation5 + $0x38] sm:$0xff]  ;;  %v256_v51 = vpack.c.bf16 %v226_v47, %v224_v45  ;;  %v228_v53 = vld [vmem:[#allocation5 + $0x20] sm:$0xff]  ;;  %v230_v54 = vld [vmem:[#allocation5 + $0x30] sm:$0xff]  ;;  %p1142_p0 = pnand %p1141_p13, %p1135_p10 }
  0x42   :  { %100 = vperm.xlu0 %1044, %v81_v6   ;;  %943 = vmatpush3.bf16.msra.mxu0 %v148_v18  ;;  %v259_v52 = vpack.c.bf16 %v231_v49, %v229_v48  ;;  %v233_v55 = vld [vmem:[#allocation5 + $0x48] sm:$0xff]  ;;  %v143_v56 = vld [vmem:[#allocation2 + $0x60] sm:$0xff]  ;;  %v235_v58 = vld [vmem:[#allocation5 + $0x58] sm:$0xff]  ;;  %v258_v59 = vpack.c.bf16 %v230_v54, %v228_v53 }
  0x43   :  { %944 = vmatprep.subr.bf16.mxu0 %v149_v26  ;;  %v144_v57 = vld [vmem:[#allocation2 + $0x68] sm:$0xff]  ;;  %284 = vmatprep.subr.bf16.mxu1 %v257_v46  ;;  %v261_v60 = vpack.c.bf16 %v235_v58, %v233_v55  ;;  %v232_v61 = vld [vmem:[#allocation5 + $0x40] sm:$0xff]  ;;  %v234_v62 = vld [vmem:[#allocation5 + $0x50] sm:$0xff] }
  0x44   :  { %285 = vmatpush1.bf16.msra.mxu1 %v256_v51  ;;  %v153_v63 = vpack.c.bf16 %v144_v57, %v143_v56  ;;  %v237_v1 = vld [vmem:[#allocation5 + $0x68] sm:$0xff]  ;;  %v239_v2 = vld [vmem:[#allocation5 + $0x78] sm:$0xff]  ;;  %v145_v3 = vld [vmem:[#allocation2 + $0x70] sm:$0xff]  ;;  %v260_v5 = vpack.c.bf16 %v234_v62, %v232_v61 }
  0x45   :  { %109 = vperm.xlu1 %1045, %v84_v8   ;;  %286 = vmatprep.subr.bf16.mxu1 %v259_v52  ;;  %v146_v4 = vld [vmem:[#allocation2 + $0x78] sm:$0xff]  ;;  %v263_v6 = vpack.c.bf16 %v239_v2, %v237_v1  ;;  %v236_v8 = vld [vmem:[#allocation5 + $0x60] sm:$0xff]  ;;  %v241_v12 = vld [vmem:[#allocation5 + $0x88] sm:$0xff] }
  0x46   :  { %106 = vperm.xlu0 %1044, %v83_v9   ;;  %945 = vmatpush3.bf16.msra.mxu0 %v149_v26  ;;  %v238_v9 = vld [vmem:[#allocation5 + $0x70] sm:$0xff]  ;;  %v154_v11 = vpack.c.bf16 %v146_v4, %v145_v3  ;;  %v243_v14 = vld [vmem:[#allocation5 + $0x98] sm:$0xff]  ;;  %v240_v18 = vld [vmem:[#allocation5 + $0x80] sm:$0xff] }
  0x47   :  { %946 = vmatprep.subr.bf16.mxu0 %v150_v35  ;;  %v262_v15 = vpack.c.bf16 %v238_v9, %v236_v8  ;;  %v265_v17 = vpack.c.bf16 %v243_v14, %v241_v12  ;;  %v242_v19 = vld [vmem:[#allocation5 + $0x90] sm:$0xff]  ;;  %v245_v20 = vld [vmem:[#allocation5 + $0xa8] sm:$0xff]  ;;  %v247_v22 = vld [vmem:[#allocation5 + $0xb8] sm:$0xff] }
  0x48   :  { %287 = vmatpush1.bf16.msra.mxu1 %v258_v59  ;;  %v264_v23 = vpack.c.bf16 %v242_v19, %v240_v18  ;;  %v267_v24 = vpack.c.bf16 %v247_v22, %v245_v20  ;;  %v244_v25 = vld [vmem:[#allocation5 + $0xa0] sm:$0xff]  ;;  %v246_v26 = vld [vmem:[#allocation5 + $0xb0] sm:$0xff]  ;;  %v249_v27 = vld [vmem:[#allocation5 + $0xc8] sm:$0xff] }
  0x49   :  { %1052 = vperm.xlu1 %1045, %v1051_v29   ;;  %288 = vmatprep.subr.bf16.mxu1 %v261_v60  ;;  %v251_v28 = vld [vmem:[#allocation5 + $0xd8] sm:$0xff]  ;;  %v266_v29 = vpack.c.bf16 %v246_v26, %v244_v25  ;;  %v248_v31 = vld [vmem:[#allocation5 + $0xc0] sm:$0xff]  ;;  %v250_v32 = vld [vmem:[#allocation5 + $0xd0] sm:$0xff] }
  0x4a   :  { %1047 = vperm.xlu0 %1044, %v1046_v30   ;;  %947 = vmatpush3.bf16.msra.mxu0 %v150_v35  ;;  %v269_v30 = vpack.c.bf16 %v251_v28, %v249_v27  ;;  %v268_v33 = vpack.c.bf16 %v250_v32, %v248_v31  ;;  %v253_v45 = vld [vmem:[#allocation5 + $0xe8] sm:$0xff]  ;;  %v255_v46 = vld [vmem:[#allocation5 + $0xf8] sm:$0xff]  ;;  %v252_v48 = vld [vmem:[#allocation5 + $0xe0] sm:$0xff] }
  0x4b   :  { %948 = vmatprep.subr.bf16.mxu0 %v151_v40  ;;  %v271_v47 = vpack.c.bf16 %v255_v46, %v253_v45  ;;  %v254_v49 = vld [vmem:[#allocation5 + $0xf0] sm:$0xff]  ;;  %v397_v51 = vld [vmem:[#allocation7 + $0x80] sm:$0xff]  ;;  %v398_v52 = vld [vmem:[#allocation7 + $0x88] sm:$0xff] }
  0x4c   :  { %289 = vmatpush1.bf16.msra.mxu1 %v260_v5  ;;  %v381_v53 = vld [vmem:[#allocation7] sm:$0xff]  ;;  %v421_v54 = vpack.c.bf16 %v398_v52, %v397_v51  ;;  %v382_v55 = vld [vmem:[#allocation7 + $0x8] sm:$0xff]  ;;  %v399_v56 = vld [vmem:[#allocation7 + $0x90] sm:$0xff] }
  0x4d   :  { %1062 = vperm.xlu1 %1045, %v1061_v38   ;;  %290 = vmatprep.subr.bf16.mxu1 %v263_v6  ;;  %v400_v57 = vld [vmem:[#allocation7 + $0x98] sm:$0xff]  ;;  %v413_v58 = vpack.c.bf16 %v382_v55, %v381_v53  ;;  %v383_v60 = vld [vmem:[#allocation7 + $0x10] sm:$0xff]  ;;  %v401_v62 = vld [vmem:[#allocation7 + $0xa0] sm:$0xff] }
  0x4e   :  { %1057 = vperm.xlu0 %1044, %v1056_v39   ;;  %949 = vmatpush3.bf16.msra.mxu0 %v151_v40  ;;  %v1171_v40 = vmov 1.0|1.0   ;;  %v422_v59 = vpack.c.bf16 %v400_v57, %v399_v56  ;;  %v384_v61 = vld [vmem:[#allocation7 + $0x18] sm:$0xff]  ;;  %v385_v3 = vld [vmem:[#allocation7 + $0x20] sm:$0xff]  ;;  %v386_v4 = vld [vmem:[#allocation7 + $0x28] sm:$0xff] }
  0x4f   :  { %950 = vmatprep.subr.bf16.mxu0 %v152_v50  ;;  %v414_v1 = vpack.c.bf16 %v384_v61, %v383_v60  ;;  %v403_v5 = vld [vmem:[#allocation7 + $0xb0] sm:$0xff]  ;;  %v404_v6 = vld [vmem:[#allocation7 + $0xb8] sm:$0xff]  ;;  %v415_v8 = vpack.c.bf16 %v386_v4, %v385_v3  ;;  %v405_v14 = vld [vmem:[#allocation7 + $0xc0] sm:$0xff] }
  0x50   :  { %291 = vmatpush1.bf16.msra.mxu1 %v262_v15  ;;  %v424_v9 = vpack.c.bf16 %v404_v6, %v403_v5  ;;  %v388_v12 = vld [vmem:[#allocation7 + $0x38] sm:$0xff]  ;;  %v406_v15 = vld [vmem:[#allocation7 + $0xc8] sm:$0xff]  ;;  %v389_v19 = vld [vmem:[#allocation7 + $0x40] sm:$0xff] }
  0x51   :  { %292 = vmatprep.subr.bf16.mxu1 %v265_v17  ;;  %v425_v18 = vpack.c.bf16 %v406_v15, %v405_v14  ;;  %v390_v20 = vld [vmem:[#allocation7 + $0x48] sm:$0xff]  ;;  %v407_v22 = vld [vmem:[#allocation7 + $0xd0] sm:$0xff]  ;;  %v393_v46 = vld [vmem:[#allocation7 + $0x60] sm:$0xff] }
  0x52   :  { %951 = vmatpush3.bf16.msra.mxu0 %v152_v50  ;;  %v270_v50 = vpack.c.bf16 %v254_v49, %v252_v48  ;;  %v411_v49 = vld [vmem:[#allocation7 + $0xf0] sm:$0xff]  ;;  %v396_v53 = vld [vmem:[#allocation7 + $0x78] sm:$0xff]  ;;  %v272_v56 = vld [vmem:[%s1421_s3] sm:$0x3] }
  0x53   :  { %952 = vmatprep.subr.bf16.mxu0 %v153_v63  ;;  %v395_v52 = vld [vmem:[#allocation7 + $0x70] sm:$0xff]  ;;  %v807_v16 = vld [vmem:[%s1425_s7] sm:$0x3f] }
  0x54   :  { %293 = vmatpush1.bf16.msra.mxu1 %v264_v23  ;;  %v408_v23 = vld [vmem:[#allocation7 + $0xd8] sm:$0xff] }
  0x55   :  { %294 = vmatprep.subr.bf16.mxu1 %v267_v24  ;;  %v417_v24 = vpack.c.bf16 %v390_v20, %v389_v19  ;;  %v426_v25 = vpack.c.bf16 %v408_v23, %v407_v22 }
  0x56   :  { %953 = vmatpush3.bf16.msra.mxu0 %v153_v63  ;;  %v402_v63 = vld [vmem:[#allocation7 + $0xa8] sm:$0xff] }
  0x57   :  { %954 = vmatprep.subr.bf16.mxu0 %v154_v11  ;;  %v423_v2 = vpack.c.bf16 %v402_v63, %v401_v62 }
  0x58   :  { %295 = vmatpush1.bf16.msra.mxu1 %v266_v29 }
  0x59   :  { %296 = vmatprep.subr.bf16.mxu1 %v269_v30 }
  0x5a   :  { %955 = vmatpush3.bf16.msra.mxu0 %v154_v11  ;;  %v387_v11 = vld [vmem:[#allocation7 + $0x30] sm:$0xff] }
  0x5b   :  { %880 = vmatprep.subr.bf16.mxu0 %v421_v54  ;;  %v416_v17 = vpack.c.bf16 %v388_v12, %v387_v11  ;;  %v420_v54 = vpack.c.bf16 %v396_v53, %v395_v52 }
  0x5c   :  { %297 = vmatpush1.bf16.msra.mxu1 %v268_v33 }
  0x5d   :  { %298 = vmatprep.subr.bf16.mxu1 %v271_v47  ;;  %v394_v47 = vld [vmem:[#allocation7 + $0x68] sm:$0xff] }
  0x5e   :  { %v419_v48 = vpack.c.bf16 %v394_v47, %v393_v46 }
  0x60   :  { %299 = vmatpush1.bf16.msra.mxu1 %v270_v50  ;;  %v412_v50 = vld [vmem:[#allocation7 + $0xf8] sm:$0xff] }
  0x61   :  { %v428_v51 = vpack.c.bf16 %v412_v50, %v411_v49 }
  0xb8   :  { %v95_v35 = vpop.permute.xlu1 %94 }
  0xb9   :  { %v89_v36 = vpop.permute.xlu0 %88  ;;  %vm113_vm12 = vcmp.eq.s32.totalorder %v86_v37, %v95_v35 }
  0xba   :  { %vm111_vm15 = vcmp.eq.s32.totalorder %v86_v37, %v89_v36 }
  0xbc   :  { %v98_v38 = vpop.permute.xlu1 %97 }
  0xbd   :  { %v92_v39 = vpop.permute.xlu0 %91  ;;  %vm114_vm13 = vcmp.eq.s32.totalorder %v86_v37, %v98_v38 }
  0xbe   :  { %vm112_vm14 = vcmp.eq.s32.totalorder %v86_v37, %v92_v39  ;;  %vm843_vm0 = vmpackc.low %vm114_vm13, %vm113_vm12  ;;  %v391_v39 = vld [vmem:[#allocation7 + $0x50] sm:$0xff]  ;;  %vm1173_vm12 = vmmov 0   ;;  %vm582_vm13 = vcmask 523264  }
  0xbf   :  { %vm841_vm1 = vmpackc.low %vm112_vm14, %vm111_vm15 }
  0xc0   :  { %956 = vmatprep.mubr.msk.bf16.mxu0 %vm841_vm1, %v1171_v40  ;;  %v104_v41 = vpop.permute.xlu1 %103 }
  0xc1   :  { %v101_v42 = vpop.permute.xlu0 %100  ;;  %vm116_vm2 = vcmp.eq.s32.totalorder %v86_v37, %v104_v41  ;;  %957 = vmatmul.mubr.msk.bf16.vlgmr.msra.gmra.mrb[0].mxu0 %vm843_vm0, %v1171_v40  ;;  %v392_v41 = vld [vmem:[#allocation7 + $0x58] sm:$0xff] }
  0xc2   :  { %vm115_vm4 = vcmp.eq.s32.totalorder %v86_v37, %v101_v42  ;;  %881 = vmatpush3.bf16.msra.mxu0 %v413_v58  ;;  %v418_v42 = vpack.c.bf16 %v392_v41, %v391_v39 }
  0xc3   :  { %vm845_vm6 = vmpackc.low %vm116_vm2, %vm115_vm4  ;;  %882 = vmatprep.subr.bf16.mxu0 %v422_v59 }
  0xc4   :  { %960 = vmatprep.mubr.msk.bf16.mxu0 %vm845_vm6, %v1171_v40  ;;  %v110_v43 = vpop.permute.xlu1 %109 }
  0xc5   :  { %v107_v44 = vpop.permute.xlu0 %106  ;;  %vm118_vm7 = vcmp.eq.s32.totalorder %v86_v37, %v110_v43  ;;  %v409_v43 = vld [vmem:[#allocation7 + $0xe0] sm:$0xff] }
  0xc6   :  { %vm117_vm9 = vcmp.eq.s32.totalorder %v86_v37, %v107_v44  ;;  %883 = vmatpush3.bf16.msra.mxu0 %v414_v1  ;;  %v410_v44 = vld [vmem:[#allocation7 + $0xe8] sm:$0xff] }
  0xc7   :  { %vm847_vm10 = vmpackc.low %vm118_vm7, %vm117_vm9  ;;  %884 = vmatprep.subr.bf16.mxu0 %v423_v2  ;;  %v427_v45 = vpack.c.bf16 %v410_v44, %v409_v43 }
  0xc9   :  { %961 = vmatmul.mubr.msk.bf16.gmra.mrb[4].mxu0 %vm847_vm10, %v1171_v40 }
  0xca   :  { %885 = vmatpush3.bf16.msra.mxu0 %v415_v8 }
  0xcb   :  { %886 = vmatprep.subr.bf16.mxu0 %v424_v9 }
  0xce   :  { %887 = vmatpush3.bf16.msra.mxu0 %v416_v17 }
  0xcf   :  { %888 = vmatprep.subr.bf16.mxu0 %v425_v18 }
  0xd2   :  { %889 = vmatpush3.bf16.msra.mxu0 %v417_v24 }
  0xd3   :  { %890 = vmatprep.subr.bf16.mxu0 %v426_v25 }
  0xd6   :  { %891 = vmatpush3.bf16.msra.mxu0 %v418_v42 }
  0xd7   :  { %892 = vmatprep.subr.bf16.mxu0 %v427_v45 }
  0xda   :  { %893 = vmatpush3.bf16.msra.mxu0 %v419_v48 }
  0xdb   :  { %894 = vmatprep.subr.bf16.mxu0 %v428_v51 }
  0xde   :  { %895 = vmatpush3.bf16.msra.mxu0 %v420_v54 }
 0x194   :  { %v958_v26 = vpop.f32.mrb[0].mxu0 }
 0x195   :  { %v189_v27 = vpop.f32.mrb[1].mxu0 }
 0x196   :  { %v959_v28 = vpop.f32.mrb[2].mxu0 }
 0x197   :  { %v221_v29 = vpack.c.bf16 %v959_v28, %v958_v26  ;;  %v192_v30 = vpop.f32.mrb[3].mxu0 }
 0x198   :  { %v220_v31 = vpack.c.bf16 %v192_v30, %v189_v27 }
 0x19a   :  { %317 = vmatmul.mubr.bf16.vlgmr.msra.gmra.mrb[0].mxu1 %v220_v31 }
 0x19b   :  { %326 = vmatprep.mubr.bf16.mxu1 %v1169_v0 }
 0x19c   :  { %v962_v32 = vpop.f32.mrb[4].mxu0 }
 0x19d   :  { %v205_v33 = vpop.f32.mrb[5].mxu0 }
 0x19e   :  { %v963_v35 = vpop.f32.mrb[6].mxu0 }
 0x19f   :  { %v223_v36 = vpack.c.bf16 %v963_v35, %v962_v32  ;;  %v208_v37 = vpop.f32.mrb[7].mxu0 }
 0x1a0   :  { %v222_v38 = vpack.c.bf16 %v208_v37, %v205_v33 }
 0x1a2   :  { %327 = vmatmul.mubr.bf16.gmra.mrb[4].mxu1 %v221_v29 }
 0x1a3   :  { %336 = vmatprep.mubr.bf16.mxu1 %v1169_v0 }
 0x1aa   :  { %337 = vmatmul.mubr.bf16.gmra.mrb[8].mxu1 %v222_v38 }
 0x1ab   :  { %346 = vmatprep.mubr.bf16.mxu1 %v1169_v0  ;;  %v275_v0 = vshrl.u32 %v85_v34, 7 }
 0x1ad   :  { %v276_v55 = vsub.s32 0, %v275_v0  ;;  %v280_v57 = vsub.s32 1, %v275_v0 }
 0x1af   :  { %v277_v58 = vrot.slane %v272_v56, %v276_v55  ;;  %v281_v59 = vrot.slane %v272_v56, %v280_v57 }
 0x1b2   :  { %347 = vmatmul.mubr.bf16.gmra.mrb[12].mxu1 %v223_v36 }
 0x1b3   :  { %980 = vmatprep.mubr.msk.f32.mxu1 %vm1173_vm12, %v1170_v21 }
 0x26d   :  { %v318_v60 = vpop.f32.mrb[0].mxu1 }
 0x26e   :  { %v319_v61 = vadd.f32 %v318_v60, %v277_v58  ;;  %v320_v62 = vpop.f32.mrb[1].mxu1  ;;  %v1172_v60 = vmov 0.0|0.0  }
 0x26f   :  { %v321_v63 = vadd.f32 %v320_v62, %v281_v59  ;;  %v322_v1 = vpop.f32.mrb[2].mxu1  ;;  %1007 = vmatprep.subr.bf16.mxu1 %v1172_v60 }
 0x270   :  { %v323_v2 = vadd.f32 %v322_v1, %v277_v58  ;;  %v324_v3 = vpop.f32.mrb[3].mxu1  ;;  %v357_v5 = vmax.f32 %v319_v61, 0.0  ;;  %v1048_v1 = vpop.permute.xlu0 %1047 }
 0x271   :  { %v325_v4 = vadd.f32 %v324_v3, %v281_v59  ;;  %v358_v8 = vmax.f32 %v321_v63, 0.0 }
 0x272   :  { %v359_v6 = vmax.f32 %v323_v2, 0.0 }
 0x273   :  { %v360_v34 = vmax.f32 %v325_v4, 0.0 }
 0x274   :  { %v373_v9 = vpack.c.bf16 %v359_v6, %v357_v5  ;;  %v1050_v5 = vunpack.i.h.bf16 %v1048_v1  ;;  %v1049_v6 = vunpack.i.l.bf16 %v1048_v1 }
 0x275   :  { %v374_v11 = vpack.c.bf16 %v360_v34, %v358_v8  ;;  %v328_v12 = vpop.f32.mrb[4].mxu1 }
 0x276   :  { %v329_v14 = vadd.f32 %v328_v12, %v277_v58  ;;  %v330_v15 = vpop.f32.mrb[5].mxu1 }
 0x277   :  { %v331_v17 = vadd.f32 %v330_v15, %v281_v59  ;;  %v332_v18 = vpop.f32.mrb[6].mxu1  ;;  %468 = vmatprep.mubr.bf16.mxu0 %v374_v11 }
 0x278   :  { %v333_v19 = vadd.f32 %v332_v18, %v277_v58  ;;  %v334_v20 = vpop.f32.mrb[7].mxu1  ;;  %469 = vmatmul.mubr.bf16.vlgmr.msra.gmra.mrb[8].mxu0 %v373_v9  ;;  %v361_v23 = vmax.f32 %v329_v14, 0.0  ;;  %v1053_v18 = vpop.permute.xlu1 %1052 }
 0x279   :  { %v335_v22 = vadd.f32 %v334_v20, %v281_v59  ;;  %v362_v25 = vmax.f32 %v331_v17, 0.0 }
 0x27a   :  { %v363_v24 = vmax.f32 %v333_v19, 0.0 }
 0x27b   :  { %v364_v26 = vmax.f32 %v335_v22, 0.0 }
 0x27c   :  { %v375_v27 = vpack.c.bf16 %v363_v24, %v361_v23  ;;  %v1055_v23 = vunpack.i.h.bf16 %v1053_v18  ;;  %v1054_v24 = vunpack.i.l.bf16 %v1053_v18 }
 0x27d   :  { %v376_v28 = vpack.c.bf16 %v364_v26, %v362_v25  ;;  %v338_v29 = vpop.f32.mrb[8].mxu1 }
 0x27e   :  { %v339_v30 = vadd.f32 %v338_v29, %v277_v58  ;;  %v340_v31 = vpop.f32.mrb[9].mxu1 }
 0x27f   :  { %v341_v32 = vadd.f32 %v340_v31, %v281_v59  ;;  %v342_v33 = vpop.f32.mrb[10].mxu1  ;;  %476 = vmatprep.mubr.bf16.mxu0 %v376_v28 }
 0x280   :  { %v343_v35 = vadd.f32 %v342_v33, %v277_v58  ;;  %v344_v36 = vpop.f32.mrb[11].mxu1  ;;  %477 = vmatmul.mubr.bf16.gmra.mrb[12].mxu0 %v375_v27  ;;  %v365_v38 = vmax.f32 %v339_v30, 0.0  ;;  %v1058_v33 = vpop.permute.xlu0 %1057 }
 0x281   :  { %v345_v37 = vadd.f32 %v344_v36, %v281_v59  ;;  %v366_v41 = vmax.f32 %v341_v32, 0.0 }
 0x282   :  { %v367_v39 = vmax.f32 %v343_v35, 0.0 }
 0x283   :  { %v368_v42 = vmax.f32 %v345_v37, 0.0 }
 0x284   :  { %v377_v43 = vpack.c.bf16 %v367_v39, %v365_v38  ;;  %v1060_v38 = vunpack.i.h.bf16 %v1058_v33  ;;  %v1059_v39 = vunpack.i.l.bf16 %v1058_v33 }
 0x285   :  { %v378_v44 = vpack.c.bf16 %v368_v42, %v366_v41  ;;  %v348_v45 = vpop.f32.mrb[12].mxu1 }
 0x286   :  { %v349_v46 = vadd.f32 %v348_v45, %v277_v58  ;;  %v350_v47 = vpop.f32.mrb[13].mxu1 }
 0x287   :  { %v351_v48 = vadd.f32 %v350_v47, %v281_v59  ;;  %v352_v49 = vpop.f32.mrb[14].mxu1  ;;  %484 = vmatprep.mubr.bf16.mxu0 %v378_v44 }
 0x288   :  { %v353_v50 = vadd.f32 %v352_v49, %v277_v58  ;;  %v354_v51 = vpop.f32.mrb[15].mxu1  ;;  %485 = vmatmul.mubr.bf16.gmra.mrb[16].mxu0 %v377_v43  ;;  %v369_v53 = vmax.f32 %v349_v46, 0.0  ;;  %v1357_v58 = vld [vmem:[%s1423_s5] ss:$0 sm:$0xff]  ;;  %v1063_v49 = vpop.permute.xlu1 %1062 }
 0x289   :  { %v355_v52 = vadd.f32 %v354_v51, %v281_v59  ;;  %v370_v0 = vmax.f32 %v351_v48, 0.0 }
 0x28a   :  { %v371_v54 = vmax.f32 %v353_v50, 0.0 }
 0x28b   :  { %v372_v55 = vmax.f32 %v355_v52, 0.0 }
 0x28c   :  { %v379_v56 = vpack.c.bf16 %v371_v54, %v369_v53  ;;  %v1065_v53 = vunpack.i.h.bf16 %v1063_v49  ;;  %v1064_v54 = vunpack.i.l.bf16 %v1063_v49 }
 0x28d   :  { %v380_v57 = vpack.c.bf16 %v372_v55, %v370_v0 }
 0x28f   :  { %492 = vmatprep.mubr.bf16.mxu0 %v380_v57 }
 0x290   :  { %493 = vmatmul.mubr.bf16.gmra.mrb[20].mxu0 %v379_v56 }
 0x34b   :  { %v896_v61 = vpop.f32.mrb[8].mxu0 }
 0x34c   :  { %v897_v59 = vpop.f32.mrb[9].mxu0 }
 0x34d   :  { %v898_v62 = vadd.f32 %v897_v59, %v896_v61  ;;  %v899_v63 = vpop.f32.mrb[10].mxu0  ;;  %v581_v61 = vld [vmem:[%s1424_s6] sm:$0xff] }
 0x34e   :  { %v900_v2 = vpop.f32.mrb[11].mxu0 }
 0x34f   :  { %v471_v3 = vadd.f32 %v898_v62, %v1357_v58  ;;  %v901_v4 = vadd.f32 %v900_v2, %v899_v63 }
 0x351   :  { %501 = vst [vmem:[#allocation8] sm:$0xff] %v471_v3  ;;  %v474_v8 = vadd.f32 %v901_v4, %v1357_v58  ;;  %v573_v34 = vmul.f32 %v1049_v6, %v471_v3 }
 0x353   :  { %502 = vst [vmem:[#allocation8 + $0x8] sm:$0xff] %v474_v8  ;;  %v574_v9 = vmul.f32 %v1050_v5, %v474_v8  ;;  %v902_v11 = vpop.f32.mrb[12].mxu0 }
 0x354   :  { %v903_v12 = vpop.f32.mrb[13].mxu0 }
 0x355   :  { %v1008_v14 = vpack.c.bf16 %v574_v9, %v573_v34  ;;  %v904_v15 = vadd.f32 %v903_v12, %v902_v11  ;;  %v905_v17 = vpop.f32.mrb[14].mxu0 }
 0x356   :  { %v906_v19 = vpop.f32.mrb[15].mxu0 }
 0x357   :  { %v479_v20 = vadd.f32 %v904_v15, %v1357_v58  ;;  %v907_v22 = vadd.f32 %v906_v19, %v905_v17  ;;  %1009 = vmatpush3.bf16.msra.mxu1 %v1008_v14 }
 0x358   :  { %1010 = vmatprep.subr.bf16.mxu1 %v1172_v60 }
 0x359   :  { %503 = vst [vmem:[#allocation8 + $0x10] sm:$0xff] %v479_v20  ;;  %v482_v25 = vadd.f32 %v907_v22, %v1357_v58  ;;  %v575_v26 = vmul.f32 %v1054_v24, %v479_v20 }
 0x35b   :  { %504 = vst [vmem:[#allocation8 + $0x18] sm:$0xff] %v482_v25  ;;  %v576_v27 = vmul.f32 %v1055_v23, %v482_v25  ;;  %v908_v28 = vpop.f32.mrb[16].mxu0 }
 0x35c   :  { %v909_v29 = vpop.f32.mrb[17].mxu0 }
 0x35d   :  { %v1011_v30 = vpack.c.bf16 %v576_v27, %v575_v26  ;;  %v910_v31 = vadd.f32 %v909_v29, %v908_v28  ;;  %v911_v32 = vpop.f32.mrb[18].mxu0 }
 0x35e   :  { %v912_v35 = vpop.f32.mrb[19].mxu0 }
 0x35f   :  { %v487_v36 = vadd.f32 %v910_v31, %v1357_v58  ;;  %v913_v37 = vadd.f32 %v912_v35, %v911_v32  ;;  %1012 = vmatpush3.bf16.msra.mxu1 %v1011_v30 }
 0x360   :  { %1013 = vmatprep.subr.bf16.mxu1 %v1172_v60 }
 0x361   :  { %505 = vst [vmem:[#allocation8 + $0x20] sm:$0xff] %v487_v36  ;;  %v490_v41 = vadd.f32 %v913_v37, %v1357_v58  ;;  %v577_v42 = vmul.f32 %v1059_v39, %v487_v36 }
 0x363   :  { %506 = vst [vmem:[#allocation8 + $0x28] sm:$0xff] %v490_v41  ;;  %v578_v43 = vmul.f32 %v1060_v38, %v490_v41  ;;  %v914_v44 = vpop.f32.mrb[20].mxu0 }
 0x364   :  { %v915_v45 = vpop.f32.mrb[21].mxu0 }
 0x365   :  { %v1014_v46 = vpack.c.bf16 %v578_v43, %v577_v42  ;;  %v916_v47 = vadd.f32 %v915_v45, %v914_v44  ;;  %v917_v48 = vpop.f32.mrb[22].mxu0 }
 0x366   :  { %v918_v50 = vpop.f32.mrb[23].mxu0 }
 0x367   :  { %v495_v51 = vadd.f32 %v916_v47, %v1357_v58  ;;  %v919_v52 = vadd.f32 %v918_v50, %v917_v48  ;;  %1015 = vmatpush3.bf16.msra.mxu1 %v1014_v46 }
 0x368   :  { %1016 = vmatprep.subr.bf16.mxu1 %v1172_v60 }
 0x369   :  { %507 = vst [vmem:[#allocation8 + $0x30] sm:$0xff] %v495_v51  ;;  %v498_v0 = vadd.f32 %v919_v52, %v1357_v58  ;;  %v579_v55 = vmul.f32 %v1064_v54, %v495_v51 }
 0x36b   :  { %508 = vst [vmem:[#allocation8 + $0x38] sm:$0xff] %v498_v0  ;;  %v580_v56 = vmul.f32 %v1065_v53, %v498_v0 }
 0x36d   :  { %v1017_v57 = vpack.c.bf16 %v580_v56, %v579_v55 }
 0x36f   :  { %1018 = vmatpush3.bf16.msra.mxu1 %v1017_v57 }
 0x370   :  { %1019 = vmatprep.subr.bf16.mxu1 %v1172_v60 }
 0x372   :  { %981 = vmatmul.mubr.msk.f32.vlgmr.msra.gmra.mrb[16].mxu1 %vm582_vm13, %v581_v61 }
 0x373   :  { %1021 = vmatpush3.bf16.msk.msra.mxu1 %vm1307_vm5, %v1171_v40  ;;  %999 = vmatprep.mubr.msk.f32.mxu1 %vm1173_vm12, %v1170_v21 }
 0x374   :  { %1022 = vmatprep.subr.bf16.mxu1 %v1172_v60 }
 0x377   :  { %1024 = vmatpush3.bf16.msk.msra.mxu1 %vm1295_vm3, %v1171_v40  ;;  %vm809_vm3 = vcmask 13312  }
 0x378   :  { %1025 = vmatprep.subr.bf16.mxu1 %v1172_v60 }
 0x37b   :  { %1027 = vmatpush3.bf16.msk.msra.mxu1 %vm1313_vm8, %v1171_v40 }
 0x37c   :  { %1028 = vmatprep.subr.bf16.mxu1 %v1172_v60 }
 0x37f   :  { %1030 = vmatpush3.bf16.msk.msra.mxu1 %vm1319_vm11, %v1171_v40 }
 0x380   :  { %1002 = vmatprep.subr.mxu1 %v1170_v21 }
 0x382   :  { %1000 = vmatmul.mubr.msk.f32.vlgmr.msra.gmra.mrb[18].mxu1 %vm582_vm13, %v581_v61 }
 0x383   :  { %1004 = vmatprep.mubr.msk.f32.mxu1 %vm1173_vm12, %v1170_v21 }
 0x445   :  { %v652_v7 = vpop.f32.mrb[16].mxu1 }
 0x446   :  { %v982_v10 = vpop.f32.mrb[17].mxu1 }
 0x455   :  { %v722_v58 = vpop.f32.mrb[18].mxu1 }
 0x456   :  { %v726_v59 = vmax.f32 %v722_v58, 1.0  ;;  %v1001_v62 = vpop.f32.mrb[19].mxu1 }
 0x458   :  { %1066 = vrsqrt.f32 %v726_v59 }
 0x462   :  { %v1067_v13 = vpop.eup %1066 }
 0x463   :  { %730 = vperm.xlu0 %1044, %v1067_v13  }
 0x4e2   :  { %v731_v63 = vpop.permute.xlu0 %730 }
 0x4e3   :  { %v733_v60 = vmul.f32 %v731_v63, %v652_v7 }
 0x4e5   :  { %v735_v1 = vrot.slane %v733_v60, 2  ;;  %1003 = vmatpush3.xpose.msra.mxu1 %v733_v60 }
 0x4e8   :  { %1005 = vmatmul.mubr.f32.vlgmr.msra.gmra.mrb[20].mxu1 %v735_v1 }
 0x5bb   :  { %v803_v40 = vpop.f32.mrb[20].mxu1 }
 0x5bc   :  { %v808_v21 = vmul.f32 %v807_v16, %v803_v40  ;;  %v1006_v2 = vpop.f32.mrb[21].mxu1 }
 0x5be   :  { %v810_v3 = vsel %vm809_vm3, %v808_v21, 0.0 }
 0x5bf   :  { %811 = vadd.xlane.f32.xlu1 %v810_v3 }
 0x5c0   :  { %1145 = shalt.err (!%p1142_p0)
}
 0x5c1   :  { %s1146_s7 = scalar_lea.hbm %s1427_s9, 1024 }
 0x5c2   :  { %p1147_p1 = scmp.ne.s32.totalorder %s1427_s9, %s1146_s7  ;;  %p1150_p2 = scmp.lt.u32.totalorder %s1146_s7, %s1427_s9 }
 0x5c4   :  { %p1152_p3 = pnand %p1150_p2, %p1147_p1 }
 0x5c6   :  { %1155 = shalt.err (!%p1152_p3)
}
 0x5c7   :  { %830 = dma.vmem_to_hbm [thread:$0]  %s825_s11, 1024, %s1427_s9, [#allocation4], %s1166_s2, %s1166_s2, %s1167_s14   ;;  %vm817_vm8 = vcmask 5120  }
 0x5c8   :  { %v814_v4 = vld [vmem:[%s1426_s8] sm:$0x3f] }
 0x5c9   :  { %vm815_vm5 = vcmp.gt.f32.partialorder %v814_v4, 0.5 }
 0x64c   :  { %v812_v5 = vpop.xlane.xlu1 %811 }
 0x64d   :  { %v813_v6 = vmul.f32 0.0078125, %v812_v5 }
 0x64f   :  { %v816_v8 = vsel %vm815_vm5, %v813_v6, -1e+20 }
 0x650   :  { %818 = vst.msk [vmem:[%s1428_s10] sm:$0x3f] %vm817_vm8, %v816_v8 }
 0x651   :  { %1160 = dma.done.wait [#allocation4], 1024  }
 0x652   :  { %1161 = vsyncadd [#allocation4], 4294966272 }
 0x653   :  { %838 = vsyncpa [#allocation3], 1 }
 0x654   :  { %839 = vsyncpa [#allocation6], 1 }
 0x655   :  { %840 = vsyncpa [#allocation4], 1 }

</bundles_post_ra>
